<compile_context>
chip_gen: v7x
topology: tpu7x:2x2x1
jax: 0.10.0
libtpu: 0.0.40
codegen_flags: <defaults>
</compile_context>

<pallas_src>
import functools

import jax
import jax.numpy as jnp
from jax.experimental import pallas as pl
from jax.experimental.pallas import tpu as pltpu


# ---------------- config (mirrors the PyTorch module's config fields) -------------
class Config:
    embed_size = 32          # in_channels of the Conv1d branches
    num_channels = 8         # out_channels of each Conv1d branch
    max_sen_len = 16         # sequence length L
    kernel_size = (3, 4, 5, 6)
    output_size = 4
    dropout_keep = 0.5       # Dropout is identity at inference (eval mode)


def _cnn_fused_kernel(x_ref, w_ref, b_ref, mask_ref, fcw_ref, fcb_ref, out_ref,
                      *, batch, seq_len, embed, kmax):
    """Whole forward pass in one kernel:
       im2col (pltpu.roll on the sublane axis — no misaligned sublane slices)
       -> single MXU matmul (B*L, kmax*E) x (kmax*E, 4*C)
       -> bias + ReLU -> precomputed 0/1 tail mask (post-ReLU, exact) -> max over L
       -> FC (B,4C)x(4C,O) -> stable softmax with EUP reciprocal."""
    bl = batch * seq_len
    x = x_ref[...]                                        # (B*L, E), lane-dense f32

    # Build the kmax-tap unfolded input once. Tap j needs out[g] = x[g + j]; a flat
    # roll can wrap across batch boundaries, but every wrapped row lands at a local
    # position >= Lout of any branch that actually uses tap j, and those rows are
    # zeroed by the post-ReLU mask, so the wrap is harmless.
    taps = [x]
    for j in range(1, kmax):
        taps.append(pltpu.roll(x, shift=bl - j, axis=0))  # == jnp.roll(x, -j, axis=0)
    x_unf = jnp.concatenate(taps, axis=1)                 # (B*L, kmax*E)

    # One big matmul for all 4 branches and all taps (zero-padded fused weights).
    fout = w_ref.shape[-1]                                # 4*C (lane-dense channels)
    h = jnp.dot(x_unf, w_ref[...], preferred_element_type=jnp.float32)
    h = jnp.maximum(h + b_ref[...], 0.0)                  # bias + ReLU   (B*L, 4C)

    # Tail mask: position l is valid for branch b only if l < L - k_b + 1.
    # Multiplying AFTER ReLU by a 0/1 mask is exact because valid outputs are >= 0.
    h3 = h.reshape(batch, seq_len, fout) * mask_ref[...]  # (B, L, 4C)
    pooled = jnp.max(h3, axis=1)                          # global MaxPool1d -> (B, 4C)

    # Dropout(config.dropout_keep) is identity at inference time (eval mode).
    logits = jnp.dot(pooled, fcw_ref[...],
                     preferred_element_type=jnp.float32) + fcb_ref[...]   # (B, O)

    # Softmax over classes (dim=1), numerically stable; reciprocal goes to the EUP.
    m = jnp.max(logits, axis=1, keepdims=True)
    e = jnp.exp(logits - m)
    out_ref[...] = e * pl.reciprocal(jnp.sum(e, axis=1, keepdims=True), approx=True)


def cnn_forward(x_features, fused, config):
    """x_features: (B, L, E) float32 (same layout the PyTorch forward receives).
       Returns softmax probabilities (B, output_size)."""
    B, L, E = x_features.shape
    assert L == config.max_sen_len and E == config.embed_size
    kmax = max(config.kernel_size)

    kernel = functools.partial(_cnn_fused_kernel,
                               batch=B, seq_len=L, embed=E, kmax=kmax)

    # Free bitcast reshape in XLA; kernel starts from the lane-dense 2D slab.
    x2d = x_features.astype(jnp.float32).reshape(B * L, E)

    # Tiny problem: everything fits in VMEM, so no grid (a grid would only add
    # ~0.35us/step overhead). If B grows, add a leading batch grid axis with
    # dimension_semantics=("parallel",) and constant index_maps for the weights.
    return pl.pallas_call(
        kernel,
        out_shape=jax.ShapeDtypeStruct((B, config.output_size), jnp.float32),
        in_specs=[pl.BlockSpec(memory_space=pltpu.VMEM)] * 6,
        out_specs=pl.BlockSpec(memory_space=pltpu.VMEM),
    )(x2d, fused["w"], fused["b"], fused["mask"], fused["fcw"], fused["fcb"])


def init_params(key, config):
    """Deterministic PyTorch-layout params with PyTorch-style uniform fan-in init."""
    E, C = config.embed_size, config.num_channels
    params = {"conv": [], "fc": None}
    for k in config.kernel_size:
        key, kw, kb = jax.random.split(key, 3)
        bound = 1.0 / (E * k) ** 0.5
        w = jax.random.uniform(kw, (C, E, k), jnp.float32, -bound, bound)  # (Cout,Cin,K)
        b = jax.random.uniform(kb, (C,), jnp.float32, -bound, bound)
        params["conv"].append((w, b))
    fan_in = C * len(config.kernel_size)
    key, kw, kb = jax.random.split(key, 3)
    bound = 1.0 / fan_in ** 0.5
    fcw = jax.random.uniform(kw, (config.output_size, fan_in), jnp.float32, -bound, bound)
    fcb = jax.random.uniform(kb, (config.output_size,), jnp.float32, -bound, bound)
    params["fc"] = (fcw, fcb)
    return params


def fuse_params(params, config):
    """Trace-time layout plumbing (done once, outside the kernel): zero-pad every
       branch's taps to kmax and concatenate branches along the channel axis into a
       single (kmax*E, 4*C) weight, one (1, 4*C) bias, and a precomputed float 0/1
       tail-validity mask of shape (1, L, 4*C)."""
    E, C, L = config.embed_size, config.num_channels, config.max_sen_len
    ks = config.kernel_size
    kmax, fout = max(ks), C * len(ks)
    w_big = jnp.zeros((kmax * E, fout), jnp.float32)
    b_big = jnp.zeros((1, fout), jnp.float32)
    mask = jnp.zeros((1, L, fout), jnp.float32)
    for i, ((w, b), k) in enumerate(zip(params["conv"], ks)):
        for j in range(k):
            w_big = w_big.at[j * E:(j + 1) * E, i * C:(i + 1) * C].set(w[:, :, j].T)
        b_big = b_big.at[0, i * C:(i + 1) * C].set(b)
        mask = mask.at[0, :L - k + 1, i * C:(i + 1) * C].set(1.0)
    fcw, fcb = params["fc"]
    return {"w": w_big, "b": b_big, "mask": mask,
            "fcw": jnp.transpose(fcw), "fcb": fcb[None, :]}


def reference_forward(x, params, config):
    """Pure-JAX reference mirroring the PyTorch module op-for-op (for validation)."""
    B, L, _ = x.shape
    feats = []
    for (w, b), k in zip(params["conv"], config.kernel_size):
        lo = L - k + 1
        acc = jnp.zeros((B, lo, config.num_channels), jnp.float32)
        for j in range(k):
            acc = acc + jnp.einsum("ble,ce->blc", x[:, j:j + lo, :], w[:, :, j])
        acc = jnp.maximum(acc + b[None, None, :], 0.0)
        feats.append(jnp.max(acc, axis=1))
    all_out = jnp.concatenate(feats, axis=1)
    fcw, fcb = params["fc"]
    logits = all_out @ fcw.T + fcb[None, :]
    return jax.nn.softmax(logits, axis=1)


if __name__ == "__main__":
    cfg = Config()
    key = jax.random.PRNGKey(0)
    key, kx, kp = jax.random.split(key, 3)

    B = 2
    # x_features as passed to the PyTorch forward: (B, max_sen_len, embed_size)
    x_features = jax.random.normal(kx, (B, cfg.max_sen_len, cfg.embed_size), jnp.float32)
    params = init_params(kp, cfg)
    fused = fuse_params(params, cfg)

    out = jax.block_until_ready(cnn_forward(x_features, fused, cfg))

    assert out.shape == (B, cfg.output_size)
    # rows of a softmax must sum to ~1 (approx reciprocal -> loosen slightly)
    assert jnp.allclose(jnp.sum(out, axis=1), 1.0, atol=3e-3)
    ref = reference_forward(x_features, params, cfg)
    assert jnp.allclose(out, ref, atol=5e-3), (out, ref)
    print("KERNEL_OK")
</pallas_src>

<mosaic_0001>
module attributes {stable_mosaic.version = 11 : i64} {
  func.func @_cnn_fused_kernel(%arg0: memref<32x32xf32, #tpu.memory_space<vmem>>, %arg1: memref<192x32xf32, #tpu.memory_space<vmem>>, %arg2: memref<1x32xf32, #tpu.memory_space<vmem>>, %arg3: memref<1x16x32xf32, #tpu.memory_space<vmem>>, %arg4: memref<32x4xf32, #tpu.memory_space<vmem>>, %arg5: memref<1x4xf32, #tpu.memory_space<vmem>>, %arg6: memref<2x4xf32, #tpu.memory_space<vmem>>) attributes {dimension_semantics = [], scalar_prefetch = 0 : i64, scratch_operands = 0 : i64, tpu.core_type = #tpu.core_type<tc>} {
    %c0 = arith.constant 0 : index
    %c0_0 = arith.constant 0 : index
    %0 = vector.load %arg0[%c0, %c0_0] : memref<32x32xf32, #tpu.memory_space<vmem>>, vector<32x32xf32>
    %c31_i32 = arith.constant 31 : i32
    %1 = tpu.dynamic_rotate %0 by %c31_i32 dim 0 : vector<32x32xf32>, i32 -> vector<32x32xf32>
    %c30_i32 = arith.constant 30 : i32
    %2 = tpu.dynamic_rotate %0 by %c30_i32 dim 0 : vector<32x32xf32>, i32 -> vector<32x32xf32>
    %c29_i32 = arith.constant 29 : i32
    %3 = tpu.dynamic_rotate %0 by %c29_i32 dim 0 : vector<32x32xf32>, i32 -> vector<32x32xf32>
    %c28_i32 = arith.constant 28 : i32
    %4 = tpu.dynamic_rotate %0 by %c28_i32 dim 0 : vector<32x32xf32>, i32 -> vector<32x32xf32>
    %c27_i32 = arith.constant 27 : i32
    %5 = tpu.dynamic_rotate %0 by %c27_i32 dim 0 : vector<32x32xf32>, i32 -> vector<32x32xf32>
    %6 = tpu.concatenate %0, %1, %2, %3, %4, %5 in 1 : vector<32x32xf32>, vector<32x32xf32>, vector<32x32xf32>, vector<32x32xf32>, vector<32x32xf32>, vector<32x32xf32> -> vector<32x192xf32>
    %c0_1 = arith.constant 0 : index
    %c0_2 = arith.constant 0 : index
    %7 = vector.load %arg1[%c0_1, %c0_2] : memref<192x32xf32, #tpu.memory_space<vmem>>, vector<192x32xf32>
    %cst = arith.constant dense<0.000000e+00> : vector<32x32xf32>
    %8 = tpu.matmul %6, %7, %cst {dimension_numbers = #tpu.dot_dimension_numbers<[1], [0], [0], [1], [0, 0, 1, 1], [], []>} : vector<32x192xf32>, vector<192x32xf32>, vector<32x32xf32> -> vector<32x32xf32>
    %c0_3 = arith.constant 0 : index
    %c0_4 = arith.constant 0 : index
    %9 = vector.load %arg2[%c0_3, %c0_4] : memref<1x32xf32, #tpu.memory_space<vmem>>, vector<1x32xf32>
    %10 = vector.broadcast %9 : vector<1x32xf32> to vector<32x32xf32>
    %11 = arith.addf %8, %10 : vector<32x32xf32>
    %cst_5 = arith.constant 0.000000e+00 : f32
    %12 = vector.broadcast %cst_5 : f32 to vector<32x32xf32>
    %13 = arith.maximumf %11, %12 : vector<32x32xf32>
    %14 = vector.shape_cast %13 : vector<32x32xf32> to vector<2x16x32xf32>
    %c0_6 = arith.constant 0 : index
    %c0_7 = arith.constant 0 : index
    %c0_8 = arith.constant 0 : index
    %15 = vector.load %arg3[%c0_6, %c0_7, %c0_8] : memref<1x16x32xf32, #tpu.memory_space<vmem>>, vector<1x16x32xf32>
    %16 = vector.broadcast %15 : vector<1x16x32xf32> to vector<2x16x32xf32>
    %17 = arith.mulf %14, %16 : vector<2x16x32xf32>
    %cst_9 = arith.constant dense<0xFF800000> : vector<2x32xf32>
    %18 = vector.multi_reduction <maximumf>, %17, %cst_9 [1] : vector<2x16x32xf32> to vector<2x32xf32>
    %c0_10 = arith.constant 0 : index
    %c0_11 = arith.constant 0 : index
    %19 = vector.load %arg4[%c0_10, %c0_11] : memref<32x4xf32, #tpu.memory_space<vmem>>, vector<32x4xf32>
    %cst_12 = arith.constant dense<0.000000e+00> : vector<2x4xf32>
    %20 = tpu.matmul %18, %19, %cst_12 {dimension_numbers = #tpu.dot_dimension_numbers<[1], [0], [0], [1], [0, 0, 1, 1], [], []>} : vector<2x32xf32>, vector<32x4xf32>, vector<2x4xf32> -> vector<2x4xf32>
    %c0_13 = arith.constant 0 : index
    %c0_14 = arith.constant 0 : index
    %21 = vector.load %arg5[%c0_13, %c0_14] : memref<1x4xf32, #tpu.memory_space<vmem>>, vector<1x4xf32>
    %22 = vector.broadcast %21 : vector<1x4xf32> to vector<2x4xf32>
    %23 = arith.addf %20, %22 : vector<2x4xf32>
    %cst_15 = arith.constant dense<0xFF800000> : vector<2xf32>
    %24 = vector.multi_reduction <maximumf>, %23, %cst_15 [1] : vector<2x4xf32> to vector<2xf32>
    %25 = vector.shape_cast %24 : vector<2xf32> to vector<2x1xf32>
    %26 = vector.broadcast %25 : vector<2x1xf32> to vector<2x4xf32>
    %27 = arith.subf %23, %26 : vector<2x4xf32>
    %28 = math.exp %27 : vector<2x4xf32>
    %cst_16 = arith.constant dense<0.000000e+00> : vector<2xf32>
    %29 = vector.multi_reduction <add>, %28, %cst_16 [1] : vector<2x4xf32> to vector<2xf32>
    %30 = vector.shape_cast %29 : vector<2xf32> to vector<2x1xf32>
    %31 = tpu.reciprocal %30 {approx = true} : vector<2x1xf32> -> vector<2x1xf32>
    %32 = vector.broadcast %31 : vector<2x1xf32> to vector<2x4xf32>
    %33 = arith.mulf %28, %32 : vector<2x4xf32>
    %c0_17 = arith.constant 0 : index
    %c0_18 = arith.constant 0 : index
    %34 = vector.load %arg6[%c0_17, %c0_18] : memref<2x4xf32, #tpu.memory_space<vmem>>, vector<2x4xf32>
    tpu.vector_store %arg6[%c0_17, %c0_18], %33 {strides = array<i32>} : memref<2x4xf32, #tpu.memory_space<vmem>>, vector<2x4xf32>,
    return
  }
}

</mosaic_0001>

<bundles_post_ra>
// kernel: tpu_custom_call.1
= control target key start
LH: loop header
LB: loop body
LE: loop exit
PB: predicated region body
PF: predicated region fallthrough
CT: control target
= control target key end

     0   :  { %v32_v3 = vlaneseq  ;;  %v553_v8 = vmov 0.0|0.0   ;;  %s554_s8 = smov 32   ;;  %s555_s13 = smov 96   ;;  %s857_s0 = inlined_call_operand.vmem [shape: f32[32,32], index: 0, kind: input, shape index: {}]   ;;  %s858_s1 = inlined_call_operand.vmem [shape: f32[192,32], index: 1, kind: input, shape index: {}]   ;;  %s859_s2 = inlined_call_operand.vmem [shape: f32[1,32], index: 2, kind: input, shape index: {}]   ;;  %s860_s3 = inlined_call_operand.vmem [shape: f32[1,16,32], index: 3, kind: input, shape index: {}]   ;;  %s861_s4 = inlined_call_operand.vmem [shape: f32[32,4], index: 4, kind: input, shape index: {}]   ;;  %s862_s5 = inlined_call_operand.vmem [shape: f32[1,4], index: 5, kind: input, shape index: {}]   ;;  %s863_s6 = inlined_call_operand.hbm [shape: f32[2,4], index: 6, kind: output, shape index: {}]  }
   0x1   :  { %v598_v0 = vld [vmem:[%s857_s0] sm:$0xff]  ;;  %v603_v1 = vld [vmem:[%s857_s0 + $0x8] sm:$0xff]  ;;  %v608_v2 = vld [vmem:[%s857_s0 + $0x10] sm:$0xff]  ;;  %451 = vmatprep.subr.bf16.mxu0 %v553_v8  ;;  %487 = vmatprep.subr.bf16.mxu1 %v553_v8 }
   0x2   :  { %v28_v4 = vrot.slane %v598_v0, 1  ;;  %v29_v5 = vrot.slane %v603_v1, 1  ;;  %v30_v6 = vrot.slane %v608_v2, 1  ;;  %v66_v7 = vrot.slane %v598_v0, 5  ;;  %v632_v17 = vld [vmem:[%s857_s0 + $0x18] sm:$0xff]  ;;  %v158_v22 = vld [vmem:[%s858_s1] sm:$0xff] }
   0x3   :  { %v616_v9 = vshrl.u32 %v32_v3, 7  ;;  %v67_v10 = vrot.slane %v603_v1, 5  ;;  %v39_v11 = vrot.slane %v598_v0, 2  ;;  %v40_v12 = vrot.slane %v603_v1, 2  ;;  %v159_v23 = vld [vmem:[%s858_s1 + $0x8] sm:$0xff]  ;;  %v160_v32 = vld [vmem:[%s858_s1 + $0x10] sm:$0xff] }
   0x4   :  { %v41_v13 = vrot.slane %v608_v2, 2  ;;  %v48_v14 = vrot.slane %v598_v0, 3  ;;  %v49_v15 = vrot.slane %v603_v1, 3  ;;  %v50_v16 = vrot.slane %v608_v2, 3  ;;  %v161_v33 = vld [vmem:[%s858_s1 + $0x18] sm:$0xff] }
   0x5   :  { %vm34_vm0 = vcmp.lt.s32.totalorder %v616_v9, 7  ;;  %vm70_vm1 = vcmp.lt.s32.totalorder %v616_v9, 3  ;;  %vm43_vm2 = vcmp.lt.s32.totalorder %v616_v9, 6  ;;  %vm52_vm3 = vcmp.lt.s32.totalorder %v616_v9, 5 }
   0x6   :  { %v36_v18 = vsel %vm34_vm0, %v29_v5, %v30_v6  ;;  %v37_v19 = vsel %vm34_vm0, %v28_v4, %v29_v5  ;;  %v73_v20 = vsel %vm70_vm1, %v66_v7, %v67_v10  ;;  %v45_v21 = vsel %vm43_vm2, %v40_v12, %v41_v13 }
   0x7   :  { %v500_v24 = vpack.i.bf16 %v36_v18, %v37_v19  ;;  %127 = vrot.lane.b32.xlu1 %v73_v20, %s554_s8  ;;  %v46_v25 = vsel %vm43_vm2, %v39_v11, %v40_v12  ;;  %v54_v26 = vsel %vm52_vm3, %v49_v15, %v50_v16  ;;  %v55_v27 = vsel %vm52_vm3, %v48_v14, %v49_v15 }
   0x8   :  { %v510_v28 = vpack.i.bf16 %v54_v26, %v55_v27  ;;  %v31_v29 = vrot.slane %v632_v17, 1  ;;  %v505_v30 = vpack.i.bf16 %v45_v21, %v46_v25  ;;  %v452_v31 = vpack.c.bf16 %v159_v23, %v158_v22 }
   0x9   :  { %501 = vrot.lane.b32.xlu0 %v500_v24, %s554_s8  ;;  %v68_v34 = vrot.slane %v608_v2, 5  ;;  %v42_v37 = vrot.slane %v632_v17, 2  ;;  %v69_v39 = vrot.slane %v632_v17, 5  ;;  %v455_v40 = vpack.c.bf16 %v161_v33, %v160_v32 }
   0xa   :  { %v35_v35 = vsel %vm34_vm0, %v30_v6, %v31_v29  ;;  %v38_v36 = vsel %vm34_vm0, %v31_v29, %v28_v4  ;;  %453 = vmatpush1.bf16.msra.mxu0 %v452_v31 }
   0xb   :  { %511 = vrot.lane.b32.xlu1 %v510_v28, %s555_s13  ;;  %v515_v38 = vpack.i.bf16 %v38_v36, %v35_v35 }
   0xc   :  { %11 = vsyncpa [#allocation3], 0  ;;  %s556_s14 = smov 64   ;;  %454 = vmatprep.subr.bf16.mxu0 %v553_v8  ;;  %v162_v41 = vld [vmem:[%s858_s1 + $0x20] sm:$0xff]  ;;  %v163_v42 = vld [vmem:[%s858_s1 + $0x28] sm:$0xff]  ;;  %v72_v43 = vsel %vm70_vm1, %v67_v10, %v68_v34  ;;  %v44_v44 = vsel %vm43_vm2, %v41_v13, %v42_v37  ;;  %v47_v45 = vsel %vm43_vm2, %v42_v37, %v39_v11  ;;  %v71_v46 = vsel %vm70_vm1, %v68_v34, %v69_v39  ;;  %s559_s17 = smov [#allocation2]  }
   0xd   :  { %506 = vrot.lane.b32.xlu0 %v505_v30, %s556_s14  ;;  %v458_v47 = vpack.c.bf16 %v163_v42, %v162_v41  ;;  %v520_v48 = vpack.i.bf16 %v47_v45, %v44_v44  ;;  %v164_v49 = vld [vmem:[%s858_s1 + $0x30] sm:$0xff]  ;;  %v165_v50 = vld [vmem:[%s858_s1 + $0x38] sm:$0xff]  ;;  %v51_v51 = vrot.slane %v632_v17, 3  ;;  %v74_v52 = vsel %vm70_vm1, %v69_v39, %v66_v7  ;;  %v166_v54 = vld [vmem:[%s858_s1 + $0x40] sm:$0xff]  ;;  %s420_s18 = sshll.u32 %s559_s17, 4  ;;  %s421_s18 = int_to_ptr.vmem [resolvable:$true] %s420_s18 }
   0xe   :  { %456 = vmatpush1.bf16.msra.mxu0 %v455_v40  ;;  %v461_v53 = vpack.c.bf16 %v165_v50, %v164_v49  ;;  %v167_v55 = vld [vmem:[%s858_s1 + $0x48] sm:$0xff]  ;;  %v168_v58 = vld [vmem:[%s858_s1 + $0x50] sm:$0xff]  ;;  %v169_v59 = vld [vmem:[%s858_s1 + $0x58] sm:$0xff]  ;;  %v57_v22 = vrot.slane %v598_v0, 4  ;;  %v58_v23 = vrot.slane %v603_v1, 4  ;;  %vm61_vm4 = vcmp.lt.s32.totalorder %v616_v9, 4  ;;  %p534_p1 = scmp.lt.s32.totalorder %s421_s18, %s421_s18 }
   0xf   :  { %516 = vrot.lane.b32.xlu1 %v515_v38, %s554_s8  ;;  %457 = vmatprep.subr.bf16.mxu0 %v553_v8  ;;  %v53_v56 = vsel %vm52_vm3, %v50_v16, %v51_v51  ;;  %v464_v57 = vpack.c.bf16 %v167_v55, %v166_v54  ;;  %v56_v60 = vsel %vm52_vm3, %v51_v51, %v48_v14  ;;  %v170_v62 = vld [vmem:[%s858_s1 + $0x60] sm:$0xff]  ;;  %v171_v63 = vld [vmem:[%s858_s1 + $0x68] sm:$0xff]  ;;  %v172_v4 = vld [vmem:[%s858_s1 + $0x70] sm:$0xff]  ;;  %vm139_vm5 = vcmask 261120  }
  0x10   :  { %v467_v61 = vpack.c.bf16 %v169_v59, %v168_v58  ;;  %v470_v3 = vpack.c.bf16 %v171_v63, %v170_v62  ;;  %v173_v5 = vld [vmem:[%s858_s1 + $0x78] sm:$0xff]  ;;  %v174_v7 = vld [vmem:[%s858_s1 + $0x80] sm:$0xff]  ;;  %v175_v10 = vld [vmem:[%s858_s1 + $0x88] sm:$0xff]  ;;  %v64_v24 = vsel %vm61_vm4, %v57_v22, %v58_v23  ;;  %vm144_vm6 = vcmask 523264  }
  0x11   :  { %129 = vrot.lane.b32.xlu0 %v72_v43, %s554_s8  ;;  %v473_v6 = vpack.c.bf16 %v173_v5, %v172_v4  ;;  %v476_v11 = vpack.c.bf16 %v175_v10, %v174_v7  ;;  %v176_v12 = vld [vmem:[%s858_s1 + $0x90] sm:$0xff]  ;;  %v177_v13 = vld [vmem:[%s858_s1 + $0x98] sm:$0xff]  ;;  %v178_v15 = vld [vmem:[%s858_s1 + $0xa0] sm:$0xff]  ;;  %v59_v30 = vrot.slane %v608_v2, 4  ;;  %v60_v31 = vrot.slane %v632_v17, 4 }
  0x12   :  { %459 = vmatpush1.bf16.msra.mxu0 %v458_v47  ;;  %v479_v14 = vpack.c.bf16 %v177_v13, %v176_v12  ;;  %v179_v16 = vld [vmem:[%s858_s1 + $0xa8] sm:$0xff]  ;;  %v180_v19 = vld [vmem:[%s858_s1 + $0xb0] sm:$0xff]  ;;  %v181_v20 = vld [vmem:[%s858_s1 + $0xb8] sm:$0xff]  ;;  %vm149_vm7 = vcmask 785408   ;;  %vm557_vm8 = vmmov 0   ;;  %vm327_vm9 = vcmask 1041409  }
  0x13   :  { %131 = vrot.lane.b32.xlu1 %v71_v46, %s554_s8  ;;  %460 = vmatprep.subr.bf16.mxu0 %v553_v8  ;;  %v482_v18 = vpack.c.bf16 %v179_v16, %v178_v15  ;;  %v485_v21 = vpack.c.bf16 %v181_v20, %v180_v19  ;;  %v63_v37 = vsel %vm61_vm4, %v58_v23, %v59_v30  ;;  %v314_v63 = vld [vmem:[%s861_s4] sm:$0xff]  ;;  %v317_v5 = vld [vmem:[%s861_s4 + $0x18] sm:$0xff]  ;;  %vm401_vm10 = vcmask 25600  }
  0x14   :  { %v62_v41 = vsel %vm61_vm4, %v59_v30, %v60_v31  ;;  %v428_v10 = vld [vmem:[%s859_s2] ss:$0 sm:$0xff] }
  0x15   :  { %521 = vrot.lane.b32.xlu0 %v520_v48, %s556_s14  ;;  %v290_v15 = vld [vmem:[%s860_s3] sm:$0xff] }
  0x16   :  { %462 = vmatpush1.bf16.msra.mxu0 %v461_v53 }
  0x17   :  { %133 = vrot.lane.b32.xlu1 %v74_v52, %s554_s8  ;;  %463 = vmatprep.subr.bf16.mxu0 %v553_v8 }
  0x19   :  { %115 = vrot.lane.b32.xlu0 %v53_v56, %s555_s13 }
  0x1a   :  { %465 = vmatpush1.bf16.msra.mxu0 %v464_v57 }
  0x1b   :  { %466 = vmatprep.subr.bf16.mxu0 %v553_v8 }
  0x1d   :  { %117 = vrot.lane.b32.xlu0 %v56_v60, %s555_s13 }
  0x1e   :  { %468 = vmatpush1.bf16.msra.mxu0 %v467_v61 }
  0x1f   :  { %469 = vmatprep.subr.bf16.mxu0 %v553_v8 }
  0x22   :  { %471 = vmatpush1.bf16.msra.mxu0 %v470_v3  ;;  %v315_v3 = vld [vmem:[%s861_s4 + $0x8] sm:$0xff] }
  0x23   :  { %472 = vmatprep.subr.bf16.mxu0 %v553_v8  ;;  %v488_v4 = vpack.c.bf16 %v315_v3, %v314_v63 }
  0x25   :  { %489 = vmatpush3.bf16.msra.mxu1 %v488_v4 }
  0x26   :  { %474 = vmatpush1.bf16.msra.mxu0 %v473_v6  ;;  %v558_v6 = vmov 0.0   ;;  %490 = vmatprep.subr.bf16.mxu1 %v553_v8 }
  0x27   :  { %475 = vmatprep.subr.bf16.mxu0 %v553_v8  ;;  %448 = vmatprep.mubr.msk.f32.mxu1 %vm557_vm8, %v558_v6 }
  0x2a   :  { %477 = vmatpush1.bf16.msra.mxu0 %v476_v11 }
  0x2b   :  { %478 = vmatprep.subr.bf16.mxu0 %v553_v8 }
  0x2e   :  { %480 = vmatpush1.bf16.msra.mxu0 %v479_v14 }
  0x2f   :  { %481 = vmatprep.subr.bf16.mxu0 %v553_v8 }
  0x32   :  { %483 = vmatpush1.bf16.msra.mxu0 %v482_v18 }
  0x33   :  { %484 = vmatprep.subr.bf16.mxu0 %v553_v8  ;;  %v291_v8 = vld [vmem:[%s860_s3 + $0x8] sm:$0xff] }
  0x36   :  { %486 = vmatpush1.bf16.msra.mxu0 %v485_v21 }
  0x79   :  { %v128_v25 = vpop.permute.xlu1 %127 }
  0x7a   :  { %v154_v26 = vsel %vm139_vm5, %v64_v24, %v128_v25 }
  0x7b   :  { %v502_v27 = vpop.permute.xlu0 %501  ;;  %429 = vmatprep.mubr.msk.f32.mxu0 %vm144_vm6, %v154_v26 }
  0x7c   :  { %v503_v28 = vunpack.i.l.bf16 %v502_v27  ;;  %v504_v32 = vunpack.i.h.bf16 %v502_v27 }
  0x7d   :  { %v512_v29 = vpop.permute.xlu1 %511 }
  0x7e   :  { %v513_v34 = vunpack.i.l.bf16 %v512_v29  ;;  %v140_v38 = vsel %vm139_vm5, %v598_v0, %v503_v28  ;;  %v514_v42 = vunpack.i.h.bf16 %v512_v29  ;;  %v141_v46 = vsel %vm139_vm5, %v603_v1, %v504_v32 }
  0x7f   :  { %v507_v33 = vpop.permute.xlu0 %506  ;;  %v65_v1 = vsel %vm61_vm4, %v60_v31, %v57_v22 }
  0x80   :  { %v509_v35 = vunpack.i.h.bf16 %v507_v33  ;;  %v508_v36 = vunpack.i.l.bf16 %v507_v33 }
  0x81   :  { %v517_v39 = vpop.permute.xlu1 %516 }
  0x82   :  { %v145_v40 = vsel %vm144_vm6, %v140_v38, %v508_v36  ;;  %v518_v45 = vunpack.i.l.bf16 %v517_v39  ;;  %v146_v48 = vsel %vm144_vm6, %v141_v46, %v509_v35  ;;  %v519_v53 = vunpack.i.h.bf16 %v517_v39 }
  0x83   :  { %v130_v43 = vpop.permute.xlu0 %129  ;;  %v150_v44 = vsel %vm149_vm7, %v145_v40, %v513_v34  ;;  %v151_v51 = vsel %vm149_vm7, %v146_v48, %v514_v42 }
  0x84   :  { %v155_v47 = vsel %vm139_vm5, %v63_v37, %v130_v43  ;;  %266 = vmatmul.mubr.f32.vlgmr.msra.gmra.mrb[0].mxu0 %v150_v44  ;;  %v142_v52 = vsel %vm139_vm5, %v608_v2, %v518_v45  ;;  %v143_v2 = vsel %vm139_vm5, %v632_v17, %v519_v53  ;;  %v316_v17 = vld [vmem:[%s861_s4 + $0x10] sm:$0xff] }
  0x85   :  { %430 = vmatprep.mubr.msk.f32.mxu0 %vm144_vm6, %v155_v47  ;;  %v132_v0 = vpop.permute.xlu1 %131  ;;  %v491_v7 = vpack.c.bf16 %v317_v5, %v316_v17 }
  0x86   :  { %v156_v49 = vsel %vm139_vm5, %v62_v41, %v132_v0 }
  0x87   :  { %v522_v50 = vpop.permute.xlu0 %521  ;;  %492 = vmatpush3.bf16.msra.mxu1 %v491_v7 }
  0x88   :  { %v523_v54 = vunpack.i.l.bf16 %v522_v50  ;;  %271 = vmatmul.mubr.f32.gmra.mrb[2].mxu0 %v151_v51  ;;  %v524_v57 = vunpack.i.h.bf16 %v522_v50  ;;  %v433_v51 = vld [vmem:[%s862_s5] ss:$0 sm:$0xff]  ;;  %s529_s5 = scalar_lea.vmem %s421_s18, 32 }
  0x89   :  { %431 = vmatprep.mubr.msk.f32.mxu0 %vm144_vm6, %v156_v49  ;;  %v134_v55 = vpop.permute.xlu1 %133  ;;  %p530_p0 = scmp.ne.s32.totalorder %s421_s18, %s529_s5  ;;  %p535_p2 = scmp.lt.s32.totalorder %s529_s5, %s529_s5 }
  0x8a   :  { %v147_v56 = vsel %vm144_vm6, %v142_v52, %v523_v54  ;;  %v157_v59 = vsel %vm139_vm5, %v65_v1, %v134_v55  ;;  %v148_v9 = vsel %vm144_vm6, %v143_v2, %v524_v57 }
  0x8b   :  { %v116_v58 = vpop.permute.xlu0 %115  ;;  %p536_p3 = por %p535_p2, %p534_p1 }
  0x8c   :  { %v152_v60 = vsel %vm149_vm7, %v147_v56, %v116_v58 }
  0x8d   :  { %276 = vmatmul.mubr.f32.gmra.mrb[4].mxu0 %v152_v60  ;;  %p537_p4 = pnand %p536_p3, %p530_p0 }
  0x8e   :  { %432 = vmatprep.mubr.msk.f32.mxu0 %vm144_vm6, %v157_v59 }
  0x8f   :  { %v118_v61 = vpop.permute.xlu0 %117 }
  0x90   :  { %v153_v62 = vsel %vm149_vm7, %v148_v9, %v118_v61 }
  0x91   :  { %281 = vmatmul.mubr.f32.gmra.mrb[6].mxu0 %v153_v62 }
 0x157   :  { %v267_v11 = vpop.f32.mrb[0].mxu0 }
 0x158   :  { %v268_v12 = vadd.f32 %v428_v10, %v267_v11  ;;  %v269_v13 = vpop.f32.mrb[1].mxu0 }
 0x15a   :  { %v286_v14 = vmax.f32 %v268_v12, 0.0 }
 0x15b   :  { %v272_v16 = vpop.f32.mrb[2].mxu0 }
 0x15c   :  { %v273_v18 = vadd.f32 %v428_v10, %v272_v16  ;;  %v274_v19 = vpop.f32.mrb[3].mxu0  ;;  %v292_v20 = vmul.f32 %v290_v15, %v286_v14 }
 0x15e   :  { %v287_v21 = vmax.f32 %v273_v18, 0.0  ;;  %v296_v26 = vsel %vm139_vm5, %v292_v20, -inf }
 0x160   :  { %v293_v22 = vmul.f32 %v291_v8, %v287_v21  ;;  %v277_v23 = vpop.f32.mrb[4].mxu0 }
 0x161   :  { %v278_v24 = vadd.f32 %v428_v10, %v277_v23  ;;  %v279_v25 = vpop.f32.mrb[5].mxu0 }
 0x162   :  { %v297_v27 = vsel %vm139_vm5, %v293_v22, -inf }
 0x163   :  { %v298_v28 = vmax.f32 %v296_v26, %v297_v27  ;;  %v288_v29 = vmax.f32 %v278_v24, 0.0 }
 0x164   :  { %v282_v30 = vpop.f32.mrb[6].mxu0 }
 0x165   :  { %v299_v31 = vrot.slane %v298_v28, 4  ;;  %v283_v32 = vadd.f32 %v428_v10, %v282_v30  ;;  %v284_v33 = vpop.f32.mrb[7].mxu0  ;;  %v294_v34 = vmul.f32 %v290_v15, %v288_v29 }
 0x167   :  { %v289_v35 = vmax.f32 %v283_v32, 0.0  ;;  %v300_v36 = vmax.f32 %v298_v28, %v299_v31  ;;  %v305_v38 = vsel %vm139_vm5, %v294_v34, -inf }
 0x169   :  { %v295_v37 = vmul.f32 %v291_v8, %v289_v35  ;;  %v301_v40 = vrot.slane %v300_v36, 2 }
 0x16b   :  { %v306_v39 = vsel %vm139_vm5, %v295_v37, -inf  ;;  %v302_v44 = vmax.f32 %v300_v36, %v301_v40 }
 0x16c   :  { %v307_v41 = vmax.f32 %v305_v38, %v306_v39 }
 0x16d   :  { %v303_v46 = vrot.slane %v302_v44, 1 }
 0x16e   :  { %v308_v42 = vrot.slane %v307_v41, 4 }
 0x16f   :  { %v304_v0 = vmax.f32 %v302_v44, %v303_v46 }
 0x170   :  { %v309_v43 = vmax.f32 %v307_v41, %v308_v42 }
 0x172   :  { %v310_v45 = vrot.slane %v309_v43, 2 }
 0x174   :  { %v311_v47 = vmax.f32 %v309_v43, %v310_v45 }
 0x176   :  { %v312_v48 = vrot.slane %v311_v47, 1 }
 0x178   :  { %v313_v49 = vmax.f32 %v311_v47, %v312_v48 }
 0x17a   :  { %v328_v50 = vsel %vm327_vm9, %v313_v49, %v304_v0 }
 0x17b   :  { %449 = vmatmul.mubr.msk.f32.vlgmr.msra.gmra.mrb[0].mxu1 %vm139_vm5, %v328_v50 }
 0x24e   :  { %v397_v52 = vpop.f32.mrb[0].mxu1 }
 0x24f   :  { %v398_v53 = vadd.f32 %v433_v51, %v397_v52  ;;  %v450_v54 = vpop.f32.mrb[1].mxu1 }
 0x251   :  { %v402_v1 = vsel %vm401_vm10, %v398_v53, -inf }
 0x252   :  { %403 = vmax.xlane.f32.xlu1 %v402_v1 }
 0x2df   :  { %v404_v55 = vpop.xlane.xlu1 %403 }
 0x2e0   :  { %v405_v56 = vsub.f32 %v398_v53, %v404_v55 }
 0x2e2   :  { %v406_v57 = vmul.f32 1.442695, %v405_v56 }
 0x2e4   :  { %525 = vpow2.f32 %v406_v57 }
 0x2ee   :  { %v526_v58 = vpop.eup %525 }
 0x2ef   :  { %v408_v59 = vsel %vm401_vm10, %v526_v58, 0.0 }
 0x2f0   :  { %409 = vadd.xlane.f32.xlu0 %v408_v59 }
 0x37d   :  { %v410_v60 = vpop.xlane.xlu0 %409 }
 0x37e   :  { %527 = vrcp.f32 %v410_v60 }
 0x388   :  { %v528_v2 = vpop.eup %527 }
 0x389   :  { %v412_v61 = vmul.f32 %v528_v2, %v526_v58 }
 0x38b   :  { %413 = vst.msk [vmem:[#allocation2] sm:$0x3] %vm401_vm10, %v412_v61 }
 0x38c   :  { %540 = shalt.err (!%p537_p4)
}
 0x38d   :  { %s541_s21 = scalar_lea.hbm %s863_s6, 32 }
 0x38e   :  { %p542_p5 = scmp.ne.s32.totalorder %s863_s6, %s541_s21  ;;  %p545_p6 = scmp.lt.u32.totalorder %s541_s21, %s863_s6 }
 0x390   :  { %p547_p7 = pnand %p545_p6, %p542_p5 }
 0x392   :  { %550 = shalt.err (!%p547_p7)
}
 0x393   :  { %423 = dma.vmem_to_hbm [thread:$0]  %s421_s18, 32, %s863_s6, [#allocation3]  }
 0x394   :  { %551 = dma.done.wait [#allocation3], 32  }
 0x395   :  { %552 = vsyncadd [#allocation3], 4294967264 }
 0x396   :  { %427 = vsyncpa [#allocation3], 1 }

</bundles_post_ra>
